<compile_context>
chip_gen: v7x
topology: tpu7x:2x2x1
jax: 0.10.0
libtpu: 0.0.40
codegen_flags: <defaults>
</compile_context>

<pallas_src>
import jax
import jax.numpy as jnp
from jax.experimental import pallas as pl
from jax.experimental.pallas import tpu as pltpu


def _round_up(x, m):
    return ((x + m - 1) // m) * m


def _discriminator_kernel(x_ref, w1_ref, b1_ref, w2_ref, b2_ref, o_ref):
    # Layer 1 on the MXU: (TM, in1) @ (in1, hid) -> (TM, hid), f32 accumulate.
    h = jnp.dot(x_ref[...], w1_ref[...], preferred_element_type=jnp.float32)
    h = jnp.maximum(h + b1_ref[...], 0.0)            # b1: (1, hid), bcast rows
    # Layer 2 (output width 1): VPU multiply + lane reduce, not a matmul.
    z = jnp.sum(h * w2_ref[...], axis=1, keepdims=True) + b2_ref[...]  # (TM, 1)
    # Exact sigmoid (exp on EUP, one divide).
    o_ref[...] = (1.0 / (1.0 + jnp.exp(-z))).astype(o_ref.dtype)


def discriminator_forward(x, w1, b1, w2, b2, *, block_n=1024):
    """x: (N, input_size+1) float32.  Returns (N, 1) float32.

    w1: (in1, hid), b1: (hid,), w2: (hid, 1), b2: (1,)  (x @ W convention).
    """
    n, in1 = x.shape
    hid = w1.shape[1]

    # Batch tile: multiple of 8 sublanes, capped by block_n.
    tm = min(block_n, _round_up(n, 8))
    tm = _round_up(tm, 8)
    n_pad = _round_up(n, tm)

    # Pad the batch so the grid tiles it exactly (pad rows are sliced off).
    x_pad = jnp.pad(x, ((0, n_pad - n), (0, 0)))
    b1_row = b1.reshape(1, hid)       # broadcast over sublanes (rows)
    w2_row = w2.reshape(1, hid)
    b2_2d = b2.reshape(1, 1)

    grid = (n_pad // tm,)

    out = pl.pallas_call(
        _discriminator_kernel,
        out_shape=jax.ShapeDtypeStruct((n_pad, 1), jnp.float32),
        grid=grid,
        in_specs=[
            pl.BlockSpec((tm, in1), lambda i: (i, 0)),    # streamed batch tiles
            pl.BlockSpec((in1, hid), lambda i: (0, 0)),   # resident weights
            pl.BlockSpec((1, hid), lambda i: (0, 0)),
            pl.BlockSpec((1, hid), lambda i: (0, 0)),
            pl.BlockSpec((1, 1), lambda i: (0, 0)),
        ],
        out_specs=pl.BlockSpec((tm, 1), lambda i: (i, 0)),
        compiler_params=pltpu.CompilerParams(
            dimension_semantics=("parallel",),            # 2-TC sharding on v7x
            vmem_limit_bytes=32 << 20,
        ),
    )(x_pad, w1, b1_row, w2_row, b2_2d)

    return out[:n]


def init_discriminator_params(key, input_size):
    """nn.Linear-style init (uniform +-1/sqrt(fan_in)); weights as (in, out)."""
    in1 = input_size + 1
    hid = input_size // 2
    k1, k2, k3, k4 = jax.random.split(key, 4)

    bound1 = 1.0 / jnp.sqrt(in1)
    w1 = jax.random.uniform(k1, (in1, hid), jnp.float32, -bound1, bound1)
    b1 = jax.random.uniform(k2, (hid,), jnp.float32, -bound1, bound1)

    bound2 = 1.0 / jnp.sqrt(hid)
    w2 = jax.random.uniform(k3, (hid, 1), jnp.float32, -bound2, bound2)
    b2 = jax.random.uniform(k4, (1,), jnp.float32, -bound2, bound2)
    return w1, b1, w2, b2


def _reference(x, w1, b1, w2, b2):
    h = jnp.maximum(x @ w1 + b1, 0.0)
    return jax.nn.sigmoid(h @ w2 + b2)


if __name__ == "__main__":
    input_size = 30          # feature dim; Linear input = input_size + 1 = 31
    key = jax.random.PRNGKey(0)
    kx1, kx2, kp = jax.random.split(key, 3)
    w1, b1, w2, b2 = init_discriminator_params(kp, input_size)

    # Small batch (single grid step).
    x1 = jax.random.normal(kx1, (8, input_size + 1), dtype=jnp.float32)
    out1 = jax.block_until_ready(discriminator_forward(x1, w1, b1, w2, b2))
    ref1 = _reference(x1, w1, b1, w2, b2)
    assert out1.shape == (8, 1)
    assert jnp.allclose(out1, ref1, atol=1e-4, rtol=1e-4)

    # Larger non-multiple batch with a small block to exercise the tiled grid
    # (3 grid steps, padded batch).
    x2 = jax.random.normal(kx2, (300, input_size + 1), dtype=jnp.float32)
    out2 = jax.block_until_ready(
        discriminator_forward(x2, w1, b1, w2, b2, block_n=128))
    ref2 = _reference(x2, w1, b1, w2, b2)
    assert out2.shape == (300, 1)
    assert jnp.allclose(out2, ref2, atol=1e-4, rtol=1e-4)

    print("KERNEL_OK")
</pallas_src>

<mosaic_0001>
module attributes {stable_mosaic.version = 11 : i64} {
  func.func @_discriminator_kernel(%arg0: i32, %arg1: memref<8x31xf32, #tpu.memory_space<vmem>>, %arg2: memref<31x15xf32, #tpu.memory_space<vmem>>, %arg3: memref<1x15xf32, #tpu.memory_space<vmem>>, %arg4: memref<1x15xf32, #tpu.memory_space<vmem>>, %arg5: memref<1x1xf32, #tpu.memory_space<vmem>>, %arg6: memref<8x1xf32, #tpu.memory_space<vmem>>) attributes {dimension_semantics = [#tpu.dimension_semantics<parallel>], iteration_bounds = array<i64: 1>, scalar_prefetch = 0 : i64, scratch_operands = 0 : i64, tpu.core_type = #tpu.core_type<tc>, window_params = [{transform_indices = @transform_0, window_bounds = array<i64: 8, 31>}, {pipeline_mode = #tpu.pipeline_mode<synchronous>, transform_indices = @transform_1, window_bounds = array<i64: 31, 15>}, {pipeline_mode = #tpu.pipeline_mode<synchronous>, transform_indices = @transform_2, window_bounds = array<i64: 1, 15>}, {pipeline_mode = #tpu.pipeline_mode<synchronous>, transform_indices = @transform_3, window_bounds = array<i64: 1, 15>}, {pipeline_mode = #tpu.pipeline_mode<synchronous>, transform_indices = @transform_4, window_bounds = array<i64: 1, 1>}, {transform_indices = @transform_5, window_bounds = array<i64: 8, 1>}]} {
    %c0 = arith.constant 0 : index
    %c0_0 = arith.constant 0 : index
    %0 = vector.load %arg1[%c0, %c0_0] : memref<8x31xf32, #tpu.memory_space<vmem>>, vector<8x31xf32>
    %c0_1 = arith.constant 0 : index
    %c0_2 = arith.constant 0 : index
    %1 = vector.load %arg2[%c0_1, %c0_2] : memref<31x15xf32, #tpu.memory_space<vmem>>, vector<31x15xf32>
    %cst = arith.constant dense<0.000000e+00> : vector<8x15xf32>
    %2 = tpu.matmul %0, %1, %cst {dimension_numbers = #tpu.dot_dimension_numbers<[1], [0], [0], [1], [0, 0, 1, 1], [], []>} : vector<8x31xf32>, vector<31x15xf32>, vector<8x15xf32> -> vector<8x15xf32>
    %c0_3 = arith.constant 0 : index
    %c0_4 = arith.constant 0 : index
    %3 = vector.load %arg3[%c0_3, %c0_4] : memref<1x15xf32, #tpu.memory_space<vmem>>, vector<1x15xf32>
    %4 = vector.broadcast %3 : vector<1x15xf32> to vector<8x15xf32>
    %5 = arith.addf %2, %4 : vector<8x15xf32>
    %cst_5 = arith.constant 0.000000e+00 : f32
    %6 = vector.broadcast %cst_5 : f32 to vector<8x15xf32>
    %7 = arith.maximumf %5, %6 : vector<8x15xf32>
    %c0_6 = arith.constant 0 : index
    %c0_7 = arith.constant 0 : index
    %8 = vector.load %arg4[%c0_6, %c0_7] : memref<1x15xf32, #tpu.memory_space<vmem>>, vector<1x15xf32>
    %9 = vector.broadcast %8 : vector<1x15xf32> to vector<8x15xf32>
    %10 = arith.mulf %7, %9 : vector<8x15xf32>
    %cst_8 = arith.constant dense<0.000000e+00> : vector<8xf32>
    %11 = vector.multi_reduction <add>, %10, %cst_8 [1] : vector<8x15xf32> to vector<8xf32>
    %12 = vector.shape_cast %11 : vector<8xf32> to vector<8x1xf32>
    %c0_9 = arith.constant 0 : index
    %c0_10 = arith.constant 0 : index
    %13 = vector.load %arg5[%c0_9, %c0_10] : memref<1x1xf32, #tpu.memory_space<vmem>>, vector<1x1xf32>
    %14 = vector.broadcast %13 : vector<1x1xf32> to vector<8x1xf32>
    %15 = arith.addf %12, %14 : vector<8x1xf32>
    %cst_11 = arith.constant 0.000000e+00 : f32
    %16 = vector.broadcast %cst_11 : f32 to vector<8x1xf32>
    %17 = arith.subf %16, %15 : vector<8x1xf32>
    %18 = math.exp %17 : vector<8x1xf32>
    %cst_12 = arith.constant 1.000000e+00 : f32
    %19 = vector.broadcast %cst_12 : f32 to vector<8x1xf32>
    %20 = arith.addf %19, %18 : vector<8x1xf32>
    %cst_13 = arith.constant 1.000000e+00 : f32
    %21 = vector.broadcast %cst_13 : f32 to vector<8x1xf32>
    %22 = arith.divf %21, %20 : vector<8x1xf32>
    %c0_14 = arith.constant 0 : index
    %c0_15 = arith.constant 0 : index
    %23 = vector.load %arg6[%c0_14, %c0_15] : memref<8x1xf32, #tpu.memory_space<vmem>>, vector<8x1xf32>
    tpu.vector_store %arg6[%c0_14, %c0_15], %22 {strides = array<i32>} : memref<8x1xf32, #tpu.memory_space<vmem>>, vector<8x1xf32>,
    return
  }
  func.func @transform_0(%arg0: i32) -> (i32, i32) {
    %c0_i32 = arith.constant 0 : i32
    %c0_i32_0 = arith.constant 0 : i32
    return %arg0, %c0_i32 : i32, i32
  }
  func.func @transform_1(%arg0: i32) -> (i32, i32) {
    %c0_i32 = arith.constant 0 : i32
    %c0_i32_0 = arith.constant 0 : i32
    %c0_i32_1 = arith.constant 0 : i32
    return %c0_i32, %c0_i32_0 : i32, i32
  }
  func.func @transform_2(%arg0: i32) -> (i32, i32) {
    %c0_i32 = arith.constant 0 : i32
    %c0_i32_0 = arith.constant 0 : i32
    %c0_i32_1 = arith.constant 0 : i32
    return %c0_i32, %c0_i32_0 : i32, i32
  }
  func.func @transform_3(%arg0: i32) -> (i32, i32) {
    %c0_i32 = arith.constant 0 : i32
    %c0_i32_0 = arith.constant 0 : i32
    %c0_i32_1 = arith.constant 0 : i32
    return %c0_i32, %c0_i32_0 : i32, i32
  }
  func.func @transform_4(%arg0: i32) -> (i32, i32) {
    %c0_i32 = arith.constant 0 : i32
    %c0_i32_0 = arith.constant 0 : i32
    %c0_i32_1 = arith.constant 0 : i32
    return %c0_i32, %c0_i32_0 : i32, i32
  }
  func.func @transform_5(%arg0: i32) -> (i32, i32) {
    %c0_i32 = arith.constant 0 : i32
    %c0_i32_0 = arith.constant 0 : i32
    return %arg0, %c0_i32 : i32, i32
  }
}

</mosaic_0001>

<bundles_post_ra>
// kernel: tpu_custom_call.1
= control target key start
LH: loop header
LB: loop body
LE: loop exit
PB: predicated region body
PF: predicated region fallthrough
CT: control target
= control target key end

     0   :  { %v181_v0 = vmov 0.0|0.0   ;;  %vm38_vm0 = vcmask 1046528   ;;  %vm182_vm1 = vmmov 0   ;;  %v183_v6 = vmov 0.0   ;;  %s242_s1 = inlined_call_operand.vmem [shape: f32[31,15], index: 1, kind: input, shape index: {}]   ;;  %s243_s0 = inlined_call_operand.vmem [shape: f32[8,31], index: 0, kind: input, shape index: {}]   ;;  %s244_s4 = inlined_call_operand.<no memory space> [shape: f32[1,1], index: 4, kind: input, shape index: {}]   ;;  %s245_s2 = inlined_call_operand.vmem [shape: f32[1,15], index: 2, kind: input, shape index: {}]   ;;  %s246_s3 = inlined_call_operand.vmem [shape: f32[1,15], index: 3, kind: input, shape index: {}]   ;;  %s247_s5 = inlined_call_operand.vmem [shape: f32[8,1], index: 5, kind: output, shape index: {}]  }
   0x1   :  { %166 = vmatprep.subr.bf16.mxu0 %v181_v0  ;;  %v23_v1 = vld [vmem:[%s242_s1] sm:$0xff]  ;;  %v24_v2 = vld [vmem:[%s242_s1 + $0x8] sm:$0xff]  ;;  %v25_v3 = vld [vmem:[%s242_s1 + $0x10] sm:$0xff]  ;;  %163 = vmatprep.mubr.msk.f32.mxu0 %vm182_vm1, %v183_v6  ;;  %vm184_vm2 = vmmov 1   ;;  %vm34_vm4 = vcmask 252928   ;;  %v10_v9 = vstv %s244_s4  ;;  %vm121_vm5 = vcmask 121856  }
   0x2   :  { %v167_v4 = vpack.c.bf16 %v24_v2, %v23_v1  ;;  %v26_v5 = vld [vmem:[%s242_s1 + $0x18] sm:$0x7f]  ;;  %vm171_vm3 = vmpackc.low %vm38_vm0, %vm184_vm2  ;;  %v22_v8 = vld [vmem:[%s243_s0] sm:$0xff]  ;;  %11 = vst [vmem:[#allocation2] sm:$0x1] %v10_v9  ;;  %vm139_vm6 = vcmask 7168  }
   0x3   :  { %v170_v7 = vpack.c.bf16 %v26_v5, %v25_v3  ;;  %v145_v10 = vld [vmem:[%s245_s2] ss:$0 sm:$0xff] }
   0x4   :  { %168 = vmatpush3.bf16.msra.mxu0 %v167_v4  ;;  %v148_v14 = vld [vmem:[%s246_s3] ss:$0 sm:$0xff] }
   0x5   :  { %169 = vmatprep.subr.bf16.mxu0 %v181_v0 }
   0x8   :  { %172 = vmatpush3.bf16.msk.msra.mxu0 %vm171_vm3, %v170_v7 }
   0x9   :  { %v149_v18 = vld [vmem:[#allocation2] ss:$0 sm:$0xff] }
   0xb   :  { %164 = vmatmul.mubr.msk.f32.vlgmr.msra.gmra.mrb[0].mxu0 %vm34_vm4, %v22_v8 }
  0xde   :  { %v108_v11 = vpop.f32.mrb[0].mxu0 }
  0xdf   :  { %v109_v12 = vadd.f32 %v145_v10, %v108_v11  ;;  %v165_v13 = vpop.f32.mrb[1].mxu0 }
  0xe1   :  { %v112_v15 = vmax.f32 %v109_v12, 0.0 }
  0xe3   :  { %v120_v16 = vmul.f32 %v148_v14, %v112_v15 }
  0xe5   :  { %v122_v17 = vsel %vm121_vm5, %v120_v16, 0.0 }
  0xe6   :  { %123 = vadd.xlane.f32.xlu0 %v122_v17 }
 0x173   :  { %v124_v19 = vpop.xlane.xlu0 %123 }
 0x174   :  { %v132_v20 = vadd.f32 %v149_v18, %v124_v19 }
 0x176   :  { %v133_v21 = vsub.f32 0.0, %v132_v20 }
 0x178   :  { %v134_v22 = vmul.f32 1.442695, %v133_v21 }
 0x17a   :  { %177 = vpow2.f32 %v134_v22 }
 0x184   :  { %v178_v23 = vpop.eup %177 }
 0x185   :  { %v136_v24 = vadd.f32 1.0, %v178_v23 }
 0x187   :  { %179 = vrcp.f32 %v136_v24 }
 0x191   :  { %v180_v25 = vpop.eup %179 }
 0x192   :  { %140 = vst.msk [vmem:[%s247_s5] sm:$0xff] %vm139_vm6, %v180_v25 }

</bundles_post_ra>
